<compile_context>
chip_gen: v6e
topology: v6e:2x2x1
jax: 0.10.0
libtpu: 0.0.40
codegen_flags: <defaults>
</compile_context>

<pallas_src>
import functools

import jax
import jax.numpy as jnp
from jax.experimental import pallas as pl
from jax.experimental.pallas import tpu as pltpu


def _round_up(x, m):
    return ((x + m - 1) // m) * m


def actor_kernel(x_ref, w1_ref, b1_ref, w2_ref, b2_ref, w3_ref, b3_ref, o_ref):
    """One batch tile of the Actor MLP.

    x_ref : (TILE_B, 3) f32       state tile (streamed per grid step)
    w1_ref: (3, H)  f32           layer-1 weight, (in, out)   [VMEM-resident]
    b1_ref: (1, H)  f32                                        [VMEM-resident]
    w2_ref: (H, H)  bf16          layer-2 weight, (in, out)    [VMEM-resident]
    b2_ref: (1, H)  f32                                        [VMEM-resident]
    w3_ref: (1, H)  f32           layer-3 weight stored as a row
    b3_ref: (1, 1)  f32 (SMEM)    layer-3 bias scalar
    o_ref : (TILE_B, 1) f32
    """
    x = x_ref[...]
    w1 = w1_ref[...]

    # Layer 1: K=3 contraction -> three broadcast FMAs on the VPU instead of a
    # nearly-empty MXU pass.
    pre1 = (x[:, 0:1] * w1[0:1, :]
            + x[:, 1:2] * w1[1:2, :]
            + x[:, 2:3] * w1[2:3, :]
            + b1_ref[...])
    h1 = jnp.tanh(pre1)

    # Layer 2: H x H matmul on the MXU, bf16 inputs with f32 accumulation.
    h2 = jnp.tanh(
        jnp.dot(h1.astype(jnp.bfloat16), w2_ref[...],
                preferred_element_type=jnp.float32)
        + b2_ref[...]
    )

    # Layer 3: N=1 output -> VPU multiply + lane reduction, plus scalar bias
    # from SMEM. Keeps the MXU / MRF clear of a 1-column result tile.
    out = jnp.sum(h2 * w3_ref[...], axis=-1, keepdims=True) + b3_ref[0, 0]
    o_ref[...] = out.astype(o_ref.dtype)


@functools.partial(jax.jit, static_argnames=("tile_b",))
def actor_forward(state, params, *, tile_b=256):
    """state: (B, 3) float32. params: dict from init_actor_params. Returns (B, 1)."""
    B = state.shape[0]
    H = params["w1"].shape[1]

    # Batch tiling: TILE_B is a multiple of 8; pad B up to a multiple of it.
    tb = _round_up(min(tile_b, _round_up(B, 8)), 8)
    Bp = _round_up(B, tb)
    x = state if Bp == B else jnp.pad(state, ((0, Bp - B), (0, 0)))

    w1, b1 = params["w1"], params["b1"]
    w2 = params["w2"].astype(jnp.bfloat16)   # bf16 MXU inputs, f32 accumulate
    b2 = params["b2"]
    w3_row = params["w3"].T                  # (1, H) row for the VPU/XLU dot
    b3 = params["b3"]                        # (1, 1) scalar bias -> SMEM

    resident = lambda i: (0, 0)              # constant block index: stays in VMEM

    # TODO(synk): for very large H, w2 would need a K-tiling ("arbitrary") grid
    # axis + f32 VMEM accumulator (v7x has only 64 MiB VMEM); unnecessary here.
    out = pl.pallas_call(
        actor_kernel,
        out_shape=jax.ShapeDtypeStruct((Bp, 1), jnp.float32),
        grid=(Bp // tb,),
        in_specs=[
            pl.BlockSpec((tb, 3), lambda i: (i, 0)),            # state tile
            pl.BlockSpec((3, H), resident),                     # w1
            pl.BlockSpec((1, H), resident),                     # b1
            pl.BlockSpec((H, H), resident),                     # w2 (bf16)
            pl.BlockSpec((1, H), resident),                     # b2
            pl.BlockSpec((1, H), resident),                     # w3 row
            pl.BlockSpec(memory_space=pltpu.MemorySpace.SMEM),  # b3 scalar
        ],
        out_specs=pl.BlockSpec((tb, 1), lambda i: (i, 0)),
        compiler_params=pltpu.CompilerParams(
            dimension_semantics=("parallel",),   # shard batch axis on v7x megacore
        ),
    )(x, w1, b1, w2, b2, w3_row, b3)

    return out[:B]


def init_actor_params(key, hidden_size, stochastic=True):
    """PyTorch-Linear-style init: U(-1/sqrt(fan_in), 1/sqrt(fan_in)).
    Weights are stored as (in_features, out_features)."""
    ks = jax.random.split(key, 6)

    def uniform(k, shape, fan_in):
        bound = 1.0 / jnp.sqrt(jnp.float32(fan_in))
        return jax.random.uniform(k, shape, jnp.float32, -bound, bound)

    H = hidden_size
    params = {
        "w1": uniform(ks[0], (3, H), 3),
        "b1": uniform(ks[1], (1, H), 3),
        "w2": uniform(ks[2], (H, H), H),
        "b2": uniform(ks[3], (1, H), H),
        "w3": uniform(ks[4], (H, 1), H),
        "b3": uniform(ks[5], (1, 1), H),
    }
    if stochastic:
        # Unused in forward(); kept for parity with the PyTorch module.
        params["policy_log_std"] = jnp.zeros((1, 1), jnp.float32)
    return params


def actor_reference(state, params):
    """Pure-JAX reference mirroring the kernel's compute precision
    (bf16 inputs / f32 accumulation for the H x H matmul)."""
    h1 = jnp.tanh(state @ params["w1"] + params["b1"])
    h2 = jnp.tanh(
        jnp.dot(h1.astype(jnp.bfloat16),
                params["w2"].astype(jnp.bfloat16),
                preferred_element_type=jnp.float32)
        + params["b2"]
    )
    return h2 @ params["w3"] + params["b3"]


if __name__ == "__main__":
    key = jax.random.PRNGKey(0)
    k_param, k_state, k_state2 = jax.random.split(key, 3)

    hidden_size = 32
    batch = 8
    params = init_actor_params(k_param, hidden_size, stochastic=True)
    state = jax.random.normal(k_state, (batch, 3), jnp.float32)

    out = jax.block_until_ready(actor_forward(state, params))
    ref = actor_reference(state, params)
    assert out.shape == (batch, 1), out.shape
    assert jnp.allclose(out, ref, atol=1e-2, rtol=1e-2), "mismatch vs reference (B=8)"

    # Exercise the multi-tile / padded-batch path (grid of 2 tiles, B % TILE_B != 0).
    batch2 = 300
    state2 = jax.random.normal(k_state2, (batch2, 3), jnp.float32)
    out2 = jax.block_until_ready(actor_forward(state2, params, tile_b=256))
    ref2 = actor_reference(state2, params)
    assert out2.shape == (batch2, 1), out2.shape
    assert jnp.allclose(out2, ref2, atol=1e-2, rtol=1e-2), "mismatch vs reference (B=300)"

    print("KERNEL_OK")
</pallas_src>

<mosaic_0001>
module attributes {stable_mosaic.version = 11 : i64} {
  func.func @actor_kernel(%arg0: i32, %arg1: memref<8x3xf32, #tpu.memory_space<vmem>>, %arg2: memref<3x32xf32, #tpu.memory_space<vmem>>, %arg3: memref<1x32xf32, #tpu.memory_space<vmem>>, %arg4: memref<32x32xbf16, #tpu.memory_space<vmem>>, %arg5: memref<1x32xf32, #tpu.memory_space<vmem>>, %arg6: memref<1x32xf32, #tpu.memory_space<vmem>>, %arg7: memref<1x1xf32, #tpu.memory_space<smem>>, %arg8: memref<8x1xf32, #tpu.memory_space<vmem>>) attributes {dimension_semantics = [#tpu.dimension_semantics<parallel>], iteration_bounds = array<i64: 1>, scalar_prefetch = 0 : i64, scratch_operands = 0 : i64, tpu.core_type = #tpu.core_type<tc>, window_params = [{transform_indices = @transform_0, window_bounds = array<i64: 8, 3>}, {pipeline_mode = #tpu.pipeline_mode<synchronous>, transform_indices = @transform_1, window_bounds = array<i64: 3, 32>}, {pipeline_mode = #tpu.pipeline_mode<synchronous>, transform_indices = @transform_2, window_bounds = array<i64: 1, 32>}, {pipeline_mode = #tpu.pipeline_mode<synchronous>, transform_indices = @transform_3, window_bounds = array<i64: 32, 32>}, {pipeline_mode = #tpu.pipeline_mode<synchronous>, transform_indices = @transform_4, window_bounds = array<i64: 1, 32>}, {pipeline_mode = #tpu.pipeline_mode<synchronous>, transform_indices = @transform_5, window_bounds = array<i64: 1, 32>}, {transform_indices = @transform_6, window_bounds = array<i64: 1, 1>}, {transform_indices = @transform_7, window_bounds = array<i64: 8, 1>}]} {
    %c0 = arith.constant 0 : index
    %c0_0 = arith.constant 0 : index
    %0 = vector.load %arg1[%c0, %c0_0] : memref<8x3xf32, #tpu.memory_space<vmem>>, vector<8x3xf32>
    %c0_1 = arith.constant 0 : index
    %c0_2 = arith.constant 0 : index
    %1 = vector.load %arg2[%c0_1, %c0_2] : memref<3x32xf32, #tpu.memory_space<vmem>>, vector<3x32xf32>
    %2 = vector.extract_strided_slice %0 {offsets = [0, 0], sizes = [8, 1], strides = [1, 1]} : vector<8x3xf32> to vector<8x1xf32>
    %3 = vector.extract_strided_slice %1 {offsets = [0, 0], sizes = [1, 32], strides = [1, 1]} : vector<3x32xf32> to vector<1x32xf32>
    %4 = vector.broadcast %2 : vector<8x1xf32> to vector<8x32xf32>
    %5 = vector.broadcast %3 : vector<1x32xf32> to vector<8x32xf32>
    %6 = arith.mulf %4, %5 : vector<8x32xf32>
    %7 = vector.extract_strided_slice %0 {offsets = [0, 1], sizes = [8, 1], strides = [1, 1]} : vector<8x3xf32> to vector<8x1xf32>
    %8 = vector.extract_strided_slice %1 {offsets = [1, 0], sizes = [1, 32], strides = [1, 1]} : vector<3x32xf32> to vector<1x32xf32>
    %9 = vector.broadcast %7 : vector<8x1xf32> to vector<8x32xf32>
    %10 = vector.broadcast %8 : vector<1x32xf32> to vector<8x32xf32>
    %11 = arith.mulf %9, %10 : vector<8x32xf32>
    %12 = arith.addf %6, %11 : vector<8x32xf32>
    %13 = vector.extract_strided_slice %0 {offsets = [0, 2], sizes = [8, 1], strides = [1, 1]} : vector<8x3xf32> to vector<8x1xf32>
    %14 = vector.extract_strided_slice %1 {offsets = [2, 0], sizes = [1, 32], strides = [1, 1]} : vector<3x32xf32> to vector<1x32xf32>
    %15 = vector.broadcast %13 : vector<8x1xf32> to vector<8x32xf32>
    %16 = vector.broadcast %14 : vector<1x32xf32> to vector<8x32xf32>
    %17 = arith.mulf %15, %16 : vector<8x32xf32>
    %18 = arith.addf %12, %17 : vector<8x32xf32>
    %c0_3 = arith.constant 0 : index
    %c0_4 = arith.constant 0 : index
    %19 = vector.load %arg3[%c0_3, %c0_4] : memref<1x32xf32, #tpu.memory_space<vmem>>, vector<1x32xf32>
    %20 = vector.broadcast %19 : vector<1x32xf32> to vector<8x32xf32>
    %21 = arith.addf %18, %20 : vector<8x32xf32>
    %22 = math.tanh %21 : vector<8x32xf32>
    %23 = arith.truncf %22 : vector<8x32xf32> to vector<8x32xbf16>
    %c0_5 = arith.constant 0 : index
    %c0_6 = arith.constant 0 : index
    %24 = vector.load %arg4[%c0_5, %c0_6] : memref<32x32xbf16, #tpu.memory_space<vmem>>, vector<32x32xbf16>
    %cst = arith.constant dense<0.000000e+00> : vector<8x32xf32>
    %25 = tpu.matmul %23, %24, %cst {dimension_numbers = #tpu.dot_dimension_numbers<[1], [0], [0], [1], [0, 0, 1, 1], [], []>} : vector<8x32xbf16>, vector<32x32xbf16>, vector<8x32xf32> -> vector<8x32xf32>
    %c0_7 = arith.constant 0 : index
    %c0_8 = arith.constant 0 : index
    %26 = vector.load %arg5[%c0_7, %c0_8] : memref<1x32xf32, #tpu.memory_space<vmem>>, vector<1x32xf32>
    %27 = vector.broadcast %26 : vector<1x32xf32> to vector<8x32xf32>
    %28 = arith.addf %25, %27 : vector<8x32xf32>
    %29 = math.tanh %28 : vector<8x32xf32>
    %c0_9 = arith.constant 0 : index
    %c0_10 = arith.constant 0 : index
    %30 = vector.load %arg6[%c0_9, %c0_10] : memref<1x32xf32, #tpu.memory_space<vmem>>, vector<1x32xf32>
    %31 = vector.broadcast %30 : vector<1x32xf32> to vector<8x32xf32>
    %32 = arith.mulf %29, %31 : vector<8x32xf32>
    %cst_11 = arith.constant dense<0.000000e+00> : vector<8xf32>
    %33 = vector.multi_reduction <add>, %32, %cst_11 [1] : vector<8x32xf32> to vector<8xf32>
    %34 = vector.shape_cast %33 : vector<8xf32> to vector<8x1xf32>
    %c0_12 = arith.constant 0 : index
    %c0_13 = arith.constant 0 : index
    %35 = memref.load %arg7[%c0_12, %c0_13] : memref<1x1xf32, #tpu.memory_space<smem>>
    %36 = vector.broadcast %35 : f32 to vector<8x1xf32>
    %37 = arith.addf %34, %36 : vector<8x1xf32>
    %c0_14 = arith.constant 0 : index
    %c0_15 = arith.constant 0 : index
    %38 = vector.load %arg8[%c0_14, %c0_15] : memref<8x1xf32, #tpu.memory_space<vmem>>, vector<8x1xf32>
    tpu.vector_store %arg8[%c0_14, %c0_15], %37 {strides = array<i32>} : memref<8x1xf32, #tpu.memory_space<vmem>>, vector<8x1xf32>,
    return
  }
  func.func @transform_0(%arg0: i32) -> (i32, i32) {
    %c0_i32 = arith.constant 0 : i32
    %c0_i32_0 = arith.constant 0 : i32
    return %arg0, %c0_i32 : i32, i32
  }
  func.func @transform_1(%arg0: i32) -> (i32, i32) {
    %c0_i32 = arith.constant 0 : i32
    %c0_i32_0 = arith.constant 0 : i32
    %c0_i32_1 = arith.constant 0 : i32
    return %c0_i32, %c0_i32_0 : i32, i32
  }
  func.func @transform_2(%arg0: i32) -> (i32, i32) {
    %c0_i32 = arith.constant 0 : i32
    %c0_i32_0 = arith.constant 0 : i32
    %c0_i32_1 = arith.constant 0 : i32
    return %c0_i32, %c0_i32_0 : i32, i32
  }
  func.func @transform_3(%arg0: i32) -> (i32, i32) {
    %c0_i32 = arith.constant 0 : i32
    %c0_i32_0 = arith.constant 0 : i32
    %c0_i32_1 = arith.constant 0 : i32
    return %c0_i32, %c0_i32_0 : i32, i32
  }
  func.func @transform_4(%arg0: i32) -> (i32, i32) {
    %c0_i32 = arith.constant 0 : i32
    %c0_i32_0 = arith.constant 0 : i32
    %c0_i32_1 = arith.constant 0 : i32
    return %c0_i32, %c0_i32_0 : i32, i32
  }
  func.func @transform_5(%arg0: i32) -> (i32, i32) {
    %c0_i32 = arith.constant 0 : i32
    %c0_i32_0 = arith.constant 0 : i32
    %c0_i32_1 = arith.constant 0 : i32
    return %c0_i32, %c0_i32_0 : i32, i32
  }
  func.func @transform_6(%arg0: i32) -> (i32, i32) {
    %c0_i32 = arith.constant 0 : i32
    %c0_i32_0 = arith.constant 0 : i32
    %c0_i32_1 = arith.constant 0 : i32
    return %c0_i32, %c0_i32_0 : i32, i32
  }
  func.func @transform_7(%arg0: i32) -> (i32, i32) {
    %c0_i32 = arith.constant 0 : i32
    %c0_i32_0 = arith.constant 0 : i32
    return %arg0, %c0_i32 : i32, i32
  }
}

</mosaic_0001>

<bundles_post_ra>
// kernel: actor_forward.1
= control target key start
LH: loop header
LB: loop body
LE: loop exit
PB: predicated region body
PF: predicated region fallthrough
CT: control target
= control target key end

     0   :  { %v190_v0 = vmov 0   ;;  %v191_v2 = vmov 2   ;;  %v192_v3 = vmov 1   ;;  %v193_v4 = vmov 0.0   ;;  %s262_s0 = inlined_call_operand.vmem [shape: f32[8,3], index: 0, kind: input, shape index: {}]   ;;  %s263_s3 = inlined_call_operand.vmem [shape: bf16[32,32], index: 3, kind: input, shape index: {}]   ;;  %s264_s1 = inlined_call_operand.vmem [shape: f32[3,32], index: 1, kind: input, shape index: {}]   ;;  %s265_s2 = inlined_call_operand.vmem [shape: f32[1,32], index: 2, kind: input, shape index: {}]   ;;  %s266_s4 = inlined_call_operand.vmem [shape: f32[1,32], index: 4, kind: input, shape index: {}]   ;;  %s267_s5 = inlined_call_operand.vmem [shape: f32[1,32], index: 5, kind: input, shape index: {}]   ;;  %s268_s6 = inlined_call_operand.<no memory space> [shape: f32[1,1], index: 6, kind: input, shape index: {}]   ;;  %s269_s7 = inlined_call_operand.vmem [shape: f32[8,1], index: 7, kind: output, shape index: {}]  }
   0x1   :  { %180 = vset.pattern.permute.xlu0 %v190_v0  ;;  %v28_v1 = vld [vmem:[%s262_s0] sm:$0xff]  ;;  %182 = vset.pattern.permute.xlu1 %v191_v2  ;;  %v184_v5 = vld [vmem:[%s263_s3 + $0x8] sm:$0xff]   ;;  %vm194_vm0 = vmmov 0   ;;  %v35_v7 = vlaneseq  ;;  %vm93_vm1 = vcmask 261120   ;;  %v150_v38 = vstv %s268_s6 }
   0x2   :  { %32 = vperm.xlu0 %180, %v28_v1   ;;  %51 = vperm.xlu1 %182, %v28_v1   ;;  %v185_v6 = vld [vmem:[%s263_s3] sm:$0xff]   ;;  %vm152_vm2 = vcmask 7168  }
   0x3   :  { %167 = vmatprep.subr.bf16.mxu0 %v193_v4  ;;  %171 = vmatprep.mubr.msk.bf16.mxu0 %vm194_vm0, %v193_v4  ;;  %v36_v8 = vshrl.u32 %v35_v7, 7  ;;  %v29_v12 = vld [vmem:[%s264_s1] sm:$0x7] }
   0x4   :  { %168 = vmatpush3.bf16.msra.mxu0 %v184_v5  ;;  %v158_v23 = vld [vmem:[%s265_s2] ss:$0 sm:$0xff] }
   0x5   :  { %169 = vmatprep.subr.bf16.mxu0 %v193_v4  ;;  %v37_v9 = vsub.s32 0, %v36_v8  ;;  %v46_v10 = vsub.s32 1, %v36_v8  ;;  %v56_v11 = vsub.s32 2, %v36_v8  ;;  %v159_v28 = vld [vmem:[%s266_s4] ss:$0 sm:$0xff] }
   0x6   :  { %181 = vset.pattern.permute.xlu0 %v192_v3  ;;  %v163_v34 = vld [vmem:[%s267_s5] ss:$0 sm:$0xff] }
   0x7   :  { %41 = vperm.xlu0 %181, %v28_v1   ;;  %v38_v14 = vrot.slane %v29_v12, %v37_v9  ;;  %v47_v15 = vrot.slane %v29_v12, %v46_v10  ;;  %v57_v16 = vrot.slane %v29_v12, %v56_v11 }
   0x8   :  { %170 = vmatpush3.bf16.msra.mxu0 %v185_v6 }
   0xb   :  { %183 = vset.pattern.permute.xlu0 %v191_v2 }
  0x7d   :  { %v33_v13 = vpop.permute.xlu0 %32  ;;  %v52_v17 = vpop.permute.xlu1 %51 }
  0x7e   :  { %v39_v19 = vmul.f32 %v38_v14, %v33_v13  ;;  %v58_v21 = vmul.f32 %v57_v16, %v52_v17 }
  0x82   :  { %v42_v18 = vpop.permute.xlu0 %41 }
  0x83   :  { %v48_v20 = vmul.f32 %v47_v15, %v42_v18 }
  0x85   :  { %v49_v22 = vadd.f32 %v48_v20, %v39_v19 }
  0x87   :  { %v59_v24 = vadd.f32 %v58_v21, %v49_v22 }
  0x89   :  { %v67_v25 = vadd.f32 %v158_v23, %v59_v24 }
  0x8b   :  { %186 = vtanh.f32 %v67_v25 }
  0x98   :  { %v187_v26 = vpop.eup %186 }
  0x99   :  { %v69_v27 = vpack.c.bf16 %v187_v26, %v187_v26 }
  0x9b   :  { %172 = vmatmul.mubr.msk.bf16.vlgmr.msra.gmra.mxu0 %vm93_vm1, %v69_v27 }
 0x15b   :  { %v131_v29 = vpop.f32.mrf.mxu0 }
 0x15c   :  { %v132_v30 = vadd.f32 %v159_v28, %v131_v29 }
 0x15d   :  { %v173_v31 = vpop.f32.mrf.mxu0 }
 0x15e   :  { %188 = vtanh.f32 %v132_v30 }
 0x15f   :  { %v134_v32 = vpop.f32.mrf.mxu0 }
 0x161   :  { %v174_v33 = vpop.f32.mrf.mxu0 }
 0x16b   :  { %v189_v35 = vpop.eup %188 }
 0x16c   :  { %v145_v36 = vmul.f32 %v189_v35, %v163_v34 }
 0x16e   :  { %v146_v37 = vsel %vm93_vm1, %v145_v36, 0.0 }
 0x16f   :  { %147 = vadd.xlane.f32.xlu1 %v146_v37 }
 0x1f8   :  { %v148_v39 = vpop.xlane.xlu1 %147 }
 0x1f9   :  { %v151_v40 = vadd.f32 %v150_v38, %v148_v39 }
 0x1fb   :  { %153 = vst.msk [vmem:[%s269_s7] sm:$0xff] %vm152_vm2, %v151_v40 }

</bundles_post_ra>
